<compile_context>
chip_gen: v7x
topology: tpu7x:2x2x1
jax: 0.10.0
libtpu: 0.0.40
codegen_flags: <defaults>
</compile_context>

<pallas_src>
import jax
import jax.numpy as jnp
from jax.experimental import pallas as pl
from jax.experimental.pallas import tpu as pltpu


LANE = 128                      # TPU lane width
MAX_T_TILE = 16384              # hard cap on lane-tile size
TILE_VMEM_BUDGET = 10 << 20     # per-tile working-set budget (bytes), all gens


# ----------------------------------------------------------------------------
# Kernel factory: one (batch, lane-tile) step of noising -> denoise -> wSSE
# ----------------------------------------------------------------------------
def _make_kernel(T, t_tile, needs_mask):
    def kernel(coef_ref, x_ref, noise_ref,
               w1_ref, b1e_ref, ew_ref, w2_ref, b2_ref,
               out_ref, acc_ref):
        b = pl.program_id(0)
        t = pl.program_id(1)

        # Reset the per-batch elementwise accumulator at the first T-tile.
        @pl.when(t == 0)
        def _():
            acc_ref[...] = jnp.zeros_like(acc_ref)

        # Per-sample Karras coefficients: scalar reads from the tiny SMEM table.
        sig     = coef_ref[b, 0]
        c_in    = coef_ref[b, 1]
        c_skip  = coef_ref[b, 2]
        c_out   = coef_ref[b, 3]
        c_noise = coef_ref[b, 4]
        w       = coef_ref[b, 5]      # loss_weight / (B*C*T), folded once

        x  = x_ref[...]               # (C, t_tile)
        nz = noise_ref[...]           # (C, t_tile)

        # x_noisy = x + sigma * noise  (scalar-broadcast VPU FMA)
        x_noisy = x + sig * nz
        x_in = c_in * x_noisy

        # Synthetic denoiser net(c_in * x_noisy, c_noise), batched over lanes.
        emb = ew_ref[...] * c_noise + b1e_ref[...]                 # (H, 1)
        # TODO(synk): for tiny C (<=8) a VPU broadcast-MAC path could replace
        #             this K=C matmul; kept on the MXU for simplicity.
        h = jnp.dot(w1_ref[...], x_in,
                    preferred_element_type=jnp.float32) + emb      # (H, t_tile)
        h = h * jax.nn.sigmoid(h)                                  # SiLU
        x_pred = jnp.dot(w2_ref[...], h,
                         preferred_element_type=jnp.float32) + b2_ref[...]

        # x_denoised = c_skip * x_noisy + c_out * x_pred
        x_den = c_skip * x_noisy + c_out * x_pred
        err = x_den - x
        sq = err * err
        if needs_mask:   # static: only compiled in when T was padded
            col = t * t_tile + jax.lax.broadcasted_iota(jnp.int32, sq.shape, 1)
            sq = jnp.where(col < T, sq, 0.0)

        # Pure VPU elementwise accumulate; defer the XLU reduction to the end.
        acc_ref[...] += sq

        # Final per-batch reduction + weighted store (once per batch).
        @pl.when(t == pl.num_programs(1) - 1)
        def _():
            out_ref[...] = (jnp.sum(acc_ref[...]) * w).reshape(1, 1)

    return kernel


# ----------------------------------------------------------------------------
# Wrapper: hoisted coefficients, native-layout BlockSpecs, VMEM-aware tiling
# ----------------------------------------------------------------------------
def kdiffusion_loss(x, noise, sigmas, params, sigma_data):
    B, C, T = x.shape
    w1, b1, ew, eb, w2, b2 = params
    H = w1.shape[0]

    # ---- hoisted Karras coefficients (one value per sample) ----
    sig = sigmas.astype(jnp.float32)
    sd2 = jnp.float32(sigma_data) ** 2
    sig2 = sig * sig
    inv = jax.lax.rsqrt(sig2 + sd2)
    c_skip = sd2 / (sig2 + sd2)
    c_out = sig * sigma_data * inv
    c_in = inv
    c_noise = jnp.log(sig) * 0.25
    lw = (sig2 + sd2) / (sig * sigma_data) ** 2
    w_b = lw / jnp.float32(B * C * T)             # folds mean over (C,T) and B
    coef = jnp.stack([sig, c_in, c_skip, c_out, c_noise, w_b], axis=1)  # (B, 6)

    # ---- VMEM-aware lane-tile size; pad only T (to a multiple of t_tile) ----
    per_lane_bytes = 4 * (9 * C + 4 * H)          # dbuf x/noise + acc + temps
    cap = max(LANE, min(MAX_T_TILE,
                        (TILE_VMEM_BUDGET // per_lane_bytes) // LANE * LANE))
    t_tile = min(cap, pl.cdiv(T, LANE) * LANE)
    T_pad = pl.cdiv(T, t_tile) * t_tile
    num_t = T_pad // t_tile
    needs_mask = (T_pad != T)

    xf = x.astype(jnp.float32)
    nf = noise.astype(jnp.float32)
    if needs_mask:
        pad = ((0, 0), (0, 0), (0, T_pad - T))
        xf = jnp.pad(xf, pad)
        nf = jnp.pad(nf, pad)

    # Merge the two (H, 1) biases into one (single bias add in-kernel).
    b1e = (b1 + eb).astype(jnp.float32)

    kernel = _make_kernel(T, t_tile, needs_mask)

    cost = pl.CostEstimate(
        flops=int(4 * H * C * B * T_pad + 16 * C * B * T_pad),
        transcendentals=int(H * B * T_pad),
        bytes_accessed=int(4 * (2 * B * C * T_pad + 6 * B
                                + 2 * H * C + 3 * H + C + B)),
    )

    lane_spec = pl.BlockSpec((pl.Squeezed(), C, t_tile), lambda b, t: (b, 0, t))
    const_spec = lambda shape: pl.BlockSpec(shape, lambda b, t: (0, 0))

    out = pl.pallas_call(
        kernel,
        out_shape=jax.ShapeDtypeStruct((B, 1, 1), jnp.float32),
        grid=(B, num_t),
        in_specs=[
            pl.BlockSpec(memory_space=pltpu.MemorySpace.SMEM),   # coef (B, 6)
            lane_spec,                                           # x     (C, t_tile)
            lane_spec,                                           # noise (C, t_tile)
            const_spec((H, C)),                                  # w1
            const_spec((H, 1)),                                  # b1 + eb
            const_spec((H, 1)),                                  # ew
            const_spec((C, H)),                                  # w2
            const_spec((C, 1)),                                  # b2
        ],
        out_specs=pl.BlockSpec((pl.Squeezed(), 1, 1), lambda b, t: (b, 0, 0)),
        scratch_shapes=[pltpu.VMEM((C, t_tile), jnp.float32)],
        compiler_params=pltpu.CompilerParams(
            dimension_semantics=("parallel", "arbitrary"),
            vmem_limit_bytes=32 * 1024 * 1024,
        ),
        cost_estimate=cost,
    )(coef, xf, nf,
      w1.astype(jnp.float32), b1e, ew.astype(jnp.float32),
      w2.astype(jnp.float32), b2.astype(jnp.float32))

    # Per-batch partial losses (already weighted & normalized) -> final scalar.
    return jnp.sum(out)


# ----------------------------------------------------------------------------
# Pure-JAX reference (mirrors the PyTorch module semantics)
# ----------------------------------------------------------------------------
def kdiffusion_loss_ref(x, noise, sigmas, params, sigma_data):
    w1, b1, ew, eb, w2, b2 = params
    B = x.shape[0]
    sig = sigmas.reshape(B, 1, 1)
    sd2 = sigma_data ** 2

    x_noisy = x + sig * noise
    c_noise = jnp.log(sig) * 0.25
    c_skip = sd2 / (sig ** 2 + sd2)
    inv = jax.lax.rsqrt(sig ** 2 + sd2)
    c_out = sig * sigma_data * inv
    c_in = inv

    x_in = c_in * x_noisy                                        # (B,C,T)
    emb = c_noise * ew[None, :, :] + eb[None, :, :]              # (B,H,1)
    h = jnp.einsum('hc,bct->bht', w1, x_in) + b1[None] + emb
    h = h * jax.nn.sigmoid(h)
    x_pred = jnp.einsum('ch,bht->bct', w2, h) + b2[None]

    x_den = c_skip * x_noisy + c_out * x_pred
    losses = jnp.mean((x_den - x) ** 2, axis=(1, 2))             # (B,)
    lw = (sigmas ** 2 + sd2) / (sigmas * sigma_data) ** 2
    return jnp.mean(losses * lw)


# ----------------------------------------------------------------------------
if __name__ == "__main__":
    B, C, T, H = 2, 4, 16, 32
    sigma_data = 0.2

    key = jax.random.PRNGKey(0)
    kx, kn, ks, k1, k2, k3, k4 = jax.random.split(key, 7)

    x = jax.random.normal(kx, (B, C, T), jnp.float32)
    noise = jax.random.normal(kn, (B, C, T), jnp.float32)

    # sigma_distribution: LogNormal(mean=-3.0, std=1.0)
    sigmas = jnp.exp(-3.0 + 1.0 * jax.random.normal(ks, (B,), jnp.float32))

    # deterministic synthetic net parameters
    w1 = 0.1 * jax.random.normal(k1, (H, C), jnp.float32)
    b1 = 0.05 * jax.random.normal(k2, (H, 1), jnp.float32)
    ew = 0.1 * jax.random.normal(k3, (H, 1), jnp.float32)
    eb = jnp.zeros((H, 1), jnp.float32)
    w2 = 0.1 * jax.random.normal(k4, (C, H), jnp.float32)
    b2 = jnp.zeros((C, 1), jnp.float32)
    params = (w1, b1, ew, eb, w2, b2)

    loss = kdiffusion_loss(x, noise, sigmas, params, sigma_data)
    loss = jax.block_until_ready(loss)

    loss_ref = kdiffusion_loss_ref(x, noise, sigmas, params, sigma_data)
    assert jnp.allclose(loss, loss_ref, rtol=1e-4, atol=1e-5), (loss, loss_ref)

    print("KERNEL_OK")
</pallas_src>

<mosaic_0001>
module attributes {stable_mosaic.version = 11 : i64} {
  func.func @kernel(%arg0: i32, %arg1: i32, %arg2: memref<2x6xf32, #tpu.memory_space<smem>>, %arg3: memref<1x4x128xf32, #tpu.memory_space<vmem>>, %arg4: memref<1x4x128xf32, #tpu.memory_space<vmem>>, %arg5: memref<32x4xf32, #tpu.memory_space<vmem>>, %arg6: memref<32x1xf32, #tpu.memory_space<vmem>>, %arg7: memref<32x1xf32, #tpu.memory_space<vmem>>, %arg8: memref<4x32xf32, #tpu.memory_space<vmem>>, %arg9: memref<4x1xf32, #tpu.memory_space<vmem>>, %arg10: memref<1x1x1xf32, #tpu.memory_space<vmem>>, %arg11: memref<4x128xf32, #tpu.memory_space<vmem>>) attributes {dimension_semantics = [#tpu.dimension_semantics<parallel>, #tpu.dimension_semantics<arbitrary>], iteration_bounds = array<i64: 2, 1>, scalar_prefetch = 0 : i64, scratch_operands = 1 : i64, tpu.core_type = #tpu.core_type<tc>, window_params = [{transform_indices = @transform_0, window_bounds = array<i64: 2, 6>}, {transform_indices = @transform_1, window_bounds = array<i64: 1, 4, 128>}, {transform_indices = @transform_2, window_bounds = array<i64: 1, 4, 128>}, {pipeline_mode = #tpu.pipeline_mode<synchronous>, transform_indices = @transform_3, window_bounds = array<i64: 32, 4>}, {pipeline_mode = #tpu.pipeline_mode<synchronous>, transform_indices = @transform_4, window_bounds = array<i64: 32, 1>}, {pipeline_mode = #tpu.pipeline_mode<synchronous>, transform_indices = @transform_5, window_bounds = array<i64: 32, 1>}, {pipeline_mode = #tpu.pipeline_mode<synchronous>, transform_indices = @transform_6, window_bounds = array<i64: 4, 32>}, {pipeline_mode = #tpu.pipeline_mode<synchronous>, transform_indices = @transform_7, window_bounds = array<i64: 4, 1>}, {transform_indices = @transform_8, window_bounds = array<i64: 1, 1, 1>}]} {
    %c0_i32 = arith.constant 0 : i32
    %0 = arith.cmpi eq, %arg1, %c0_i32 : i32
    %1 = arith.extui %0 : i1 to i32
    %c0_i32_0 = arith.constant 0 : i32
    %2 = arith.cmpi ne, %1, %c0_i32_0 : i32
    scf.if %2 {
      %cst_26 = arith.constant 0.000000e+00 : f32
      %65 = vector.broadcast %cst_26 : f32 to vector<4x128xf32>
      %c0_27 = arith.constant 0 : index
      %c0_28 = arith.constant 0 : index
      %66 = vector.load %arg11[%c0_27, %c0_28] : memref<4x128xf32, #tpu.memory_space<vmem>>, vector<4x128xf32>
      tpu.vector_store %arg11[%c0_27, %c0_28], %65 {strides = array<i32>} : memref<4x128xf32, #tpu.memory_space<vmem>>, vector<4x128xf32>,
    } else {
    }
    %3 = arith.index_cast %arg0 : i32 to index
    %c0 = arith.constant 0 : index
    %4 = memref.load %arg2[%3, %c0] : memref<2x6xf32, #tpu.memory_space<smem>>
    %5 = arith.index_cast %arg0 : i32 to index
    %c1 = arith.constant 1 : index
    %6 = memref.load %arg2[%5, %c1] : memref<2x6xf32, #tpu.memory_space<smem>>
    %7 = arith.index_cast %arg0 : i32 to index
    %c2 = arith.constant 2 : index
    %8 = memref.load %arg2[%7, %c2] : memref<2x6xf32, #tpu.memory_space<smem>>
    %9 = arith.index_cast %arg0 : i32 to index
    %c3 = arith.constant 3 : index
    %10 = memref.load %arg2[%9, %c3] : memref<2x6xf32, #tpu.memory_space<smem>>
    %11 = arith.index_cast %arg0 : i32 to index
    %c4 = arith.constant 4 : index
    %12 = memref.load %arg2[%11, %c4] : memref<2x6xf32, #tpu.memory_space<smem>>
    %13 = arith.index_cast %arg0 : i32 to index
    %c5 = arith.constant 5 : index
    %14 = memref.load %arg2[%13, %c5] : memref<2x6xf32, #tpu.memory_space<smem>>
    %c0_1 = arith.constant 0 : index
    %c0_2 = arith.constant 0 : index
    %c0_3 = arith.constant 0 : index
    %15 = vector.load %arg3[%c0_1, %c0_2, %c0_3] : memref<1x4x128xf32, #tpu.memory_space<vmem>>, vector<1x4x128xf32>
    %16 = vector.shape_cast %15 : vector<1x4x128xf32> to vector<4x128xf32>
    %c0_4 = arith.constant 0 : index
    %c0_5 = arith.constant 0 : index
    %c0_6 = arith.constant 0 : index
    %17 = vector.load %arg4[%c0_4, %c0_5, %c0_6] : memref<1x4x128xf32, #tpu.memory_space<vmem>>, vector<1x4x128xf32>
    %18 = vector.shape_cast %17 : vector<1x4x128xf32> to vector<4x128xf32>
    %19 = vector.broadcast %4 : f32 to vector<4x128xf32>
    %20 = arith.mulf %19, %18 : vector<4x128xf32>
    %21 = arith.addf %16, %20 : vector<4x128xf32>
    %22 = vector.broadcast %6 : f32 to vector<4x128xf32>
    %23 = arith.mulf %22, %21 : vector<4x128xf32>
    %c0_7 = arith.constant 0 : index
    %c0_8 = arith.constant 0 : index
    %24 = vector.load %arg7[%c0_7, %c0_8] : memref<32x1xf32, #tpu.memory_space<vmem>>, vector<32x1xf32>
    %25 = vector.broadcast %12 : f32 to vector<32x1xf32>
    %26 = arith.mulf %24, %25 : vector<32x1xf32>
    %c0_9 = arith.constant 0 : index
    %c0_10 = arith.constant 0 : index
    %27 = vector.load %arg6[%c0_9, %c0_10] : memref<32x1xf32, #tpu.memory_space<vmem>>, vector<32x1xf32>
    %28 = arith.addf %26, %27 : vector<32x1xf32>
    %c0_11 = arith.constant 0 : index
    %c0_12 = arith.constant 0 : index
    %29 = vector.load %arg5[%c0_11, %c0_12] : memref<32x4xf32, #tpu.memory_space<vmem>>, vector<32x4xf32>
    %cst = arith.constant dense<0.000000e+00> : vector<32x128xf32>
    %30 = tpu.matmul %29, %23, %cst {dimension_numbers = #tpu.dot_dimension_numbers<[1], [0], [0], [1], [0, 0, 1, 1], [], []>} : vector<32x4xf32>, vector<4x128xf32>, vector<32x128xf32> -> vector<32x128xf32>
    %31 = vector.broadcast %28 : vector<32x1xf32> to vector<32x128xf32>
    %32 = arith.addf %30, %31 : vector<32x128xf32>
    %33 = arith.negf %32 : vector<32x128xf32>
    %34 = math.exp %33 : vector<32x128xf32>
    %cst_13 = arith.constant 1.000000e+00 : f32
    %35 = vector.broadcast %cst_13 : f32 to vector<32x128xf32>
    %36 = arith.addf %35, %34 : vector<32x128xf32>
    %37 = arith.divf %35, %36 : vector<32x128xf32>
    %38 = arith.mulf %32, %37 : vector<32x128xf32>
    %c0_14 = arith.constant 0 : index
    %c0_15 = arith.constant 0 : index
    %39 = vector.load %arg8[%c0_14, %c0_15] : memref<4x32xf32, #tpu.memory_space<vmem>>, vector<4x32xf32>
    %cst_16 = arith.constant dense<0.000000e+00> : vector<4x128xf32>
    %40 = tpu.matmul %39, %38, %cst_16 {dimension_numbers = #tpu.dot_dimension_numbers<[1], [0], [0], [1], [0, 0, 1, 1], [], []>} : vector<4x32xf32>, vector<32x128xf32>, vector<4x128xf32> -> vector<4x128xf32>
    %c0_17 = arith.constant 0 : index
    %c0_18 = arith.constant 0 : index
    %41 = vector.load %arg9[%c0_17, %c0_18] : memref<4x1xf32, #tpu.memory_space<vmem>>, vector<4x1xf32>
    %42 = vector.broadcast %41 : vector<4x1xf32> to vector<4x128xf32>
    %43 = arith.addf %40, %42 : vector<4x128xf32>
    %44 = vector.broadcast %8 : f32 to vector<4x128xf32>
    %45 = arith.mulf %44, %21 : vector<4x128xf32>
    %46 = vector.broadcast %10 : f32 to vector<4x128xf32>
    %47 = arith.mulf %46, %43 : vector<4x128xf32>
    %48 = arith.addf %45, %47 : vector<4x128xf32>
    %49 = arith.subf %48, %16 : vector<4x128xf32>
    %50 = arith.mulf %49, %49 : vector<4x128xf32>
    %c128_i32 = arith.constant 128 : i32
    %51 = arith.muli %arg1, %c128_i32 : i32
    %52 = tpu.iota {dimensions = array<i32: 1>} : vector<4x128xi32>
    %53 = vector.broadcast %51 : i32 to vector<4x128xi32>
    %54 = arith.addi %53, %52 : vector<4x128xi32>
    %c16_i32 = arith.constant 16 : i32
    %55 = vector.broadcast %c16_i32 : i32 to vector<4x128xi32>
    %56 = arith.cmpi slt, %54, %55 : vector<4x128xi32>
    %cst_19 = arith.constant 0.000000e+00 : f32
    %57 = vector.broadcast %cst_19 : f32 to vector<4x128xf32>
    %58 = arith.select %56, %50, %57 : vector<4x128xi1>, vector<4x128xf32>
    %c0_20 = arith.constant 0 : index
    %c0_21 = arith.constant 0 : index
    %59 = vector.load %arg11[%c0_20, %c0_21] : memref<4x128xf32, #tpu.memory_space<vmem>>, vector<4x128xf32>
    %60 = arith.addf %59, %58 : vector<4x128xf32>
    %c0_22 = arith.constant 0 : index
    %c0_23 = arith.constant 0 : index
    %61 = vector.load %arg11[%c0_22, %c0_23] : memref<4x128xf32, #tpu.memory_space<vmem>>, vector<4x128xf32>
    tpu.vector_store %arg11[%c0_22, %c0_23], %60 {strides = array<i32>} : memref<4x128xf32, #tpu.memory_space<vmem>>, vector<4x128xf32>,
    %c0_i32_24 = arith.constant 0 : i32
    %62 = arith.cmpi eq, %arg1, %c0_i32_24 : i32
    %63 = arith.extui %62 : i1 to i32
    %c0_i32_25 = arith.constant 0 : i32
    %64 = arith.cmpi ne, %63, %c0_i32_25 : i32
    scf.if %64 {
      %c0_26 = arith.constant 0 : index
      %c0_27 = arith.constant 0 : index
      %65 = vector.load %arg11[%c0_26, %c0_27] : memref<4x128xf32, #tpu.memory_space<vmem>>, vector<4x128xf32>
      %66 = vector.shape_cast %65 : vector<4x128xf32> to vector<1x4x128xf32>
      %cst_28 = arith.constant dense<0.000000e+00> : vector<1xf32>
      %67 = vector.multi_reduction <add>, %66, %cst_28 [1, 2] : vector<1x4x128xf32> to vector<1xf32>
      %68 = vector.shape_cast %67 : vector<1xf32> to vector<1x1x1xf32>
      %69 = vector.extract %68[0, 0, 0] : f32 from vector<1x1x1xf32>
      %70 = arith.mulf %69, %14 : f32
      %71 = vector.broadcast %70 : f32 to vector<1x1xf32>
      %c0_29 = arith.constant 0 : index
      %c0_30 = arith.constant 0 : index
      %c0_31 = arith.constant 0 : index
      %72 = vector.load %arg10[%c0_29, %c0_30, %c0_31] : memref<1x1x1xf32, #tpu.memory_space<vmem>>, vector<1x1x1xf32>
      %73 = vector.shape_cast %72 : vector<1x1x1xf32> to vector<1x1xf32>
      %74 = vector.shape_cast %71 : vector<1x1xf32> to vector<1x1x1xf32>
      tpu.vector_store %arg10[%c0_29, %c0_30, %c0_31], %74 {strides = array<i32>} : memref<1x1x1xf32, #tpu.memory_space<vmem>>, vector<1x1x1xf32>,
    } else {
    }
    return
  }
  func.func @transform_0(%arg0: i32, %arg1: i32) -> (i32, i32) {
    %c0_i32 = arith.constant 0 : i32
    %c0_i32_0 = arith.constant 0 : i32
    %c0_i32_1 = arith.constant 0 : i32
    return %c0_i32, %c0_i32_0 : i32, i32
  }
  func.func @transform_1(%arg0: i32, %arg1: i32) -> (i32, i32, i32) {
    %c0_i32 = arith.constant 0 : i32
    %c0_i32_0 = arith.constant 0 : i32
    return %arg0, %c0_i32, %arg1 : i32, i32, i32
  }
  func.func @transform_2(%arg0: i32, %arg1: i32) -> (i32, i32, i32) {
    %c0_i32 = arith.constant 0 : i32
    %c0_i32_0 = arith.constant 0 : i32
    return %arg0, %c0_i32, %arg1 : i32, i32, i32
  }
  func.func @transform_3(%arg0: i32, %arg1: i32) -> (i32, i32) {
    %c0_i32 = arith.constant 0 : i32
    %c0_i32_0 = arith.constant 0 : i32
    %c0_i32_1 = arith.constant 0 : i32
    return %c0_i32, %c0_i32_0 : i32, i32
  }
  func.func @transform_4(%arg0: i32, %arg1: i32) -> (i32, i32) {
    %c0_i32 = arith.constant 0 : i32
    %c0_i32_0 = arith.constant 0 : i32
    %c0_i32_1 = arith.constant 0 : i32
    return %c0_i32, %c0_i32_0 : i32, i32
  }
  func.func @transform_5(%arg0: i32, %arg1: i32) -> (i32, i32) {
    %c0_i32 = arith.constant 0 : i32
    %c0_i32_0 = arith.constant 0 : i32
    %c0_i32_1 = arith.constant 0 : i32
    return %c0_i32, %c0_i32_0 : i32, i32
  }
  func.func @transform_6(%arg0: i32, %arg1: i32) -> (i32, i32) {
    %c0_i32 = arith.constant 0 : i32
    %c0_i32_0 = arith.constant 0 : i32
    %c0_i32_1 = arith.constant 0 : i32
    return %c0_i32, %c0_i32_0 : i32, i32
  }
  func.func @transform_7(%arg0: i32, %arg1: i32) -> (i32, i32) {
    %c0_i32 = arith.constant 0 : i32
    %c0_i32_0 = arith.constant 0 : i32
    %c0_i32_1 = arith.constant 0 : i32
    return %c0_i32, %c0_i32_0 : i32, i32
  }
  func.func @transform_8(%arg0: i32, %arg1: i32) -> (i32, i32, i32) {
    %c0_i32 = arith.constant 0 : i32
    %c0_i32_0 = arith.constant 0 : i32
    %c0_i32_1 = arith.constant 0 : i32
    return %arg0, %c0_i32, %c0_i32_0 : i32, i32, i32
  }
}

</mosaic_0001>

<bundles_post_ra>
// kernel: tpu_custom_call.1
= control target key start
LH: loop header
LB: loop body
LE: loop exit
PB: predicated region body
PF: predicated region fallthrough
CT: control target
= control target key end

     0   :  { %13 = vsyncpa [#allocation4], 0  ;;  %s970_s27 = smov 0   ;;  %s972_s28 = smov 0   ;;  %s1102_s0 = inlined_call_operand.vmem [shape: f32[2,6], index: 0, kind: input, shape index: {}]   ;;  %s1103_s1 = inlined_call_operand.vmem [shape: f32[2,4,128], index: 1, kind: input, shape index: {}]   ;;  %s1104_s2 = inlined_call_operand.vmem [shape: f32[2,4,128], index: 2, kind: input, shape index: {}]   ;;  %s1105_s3 = inlined_call_operand.vmem [shape: f32[32,4], index: 3, kind: input, shape index: {}]   ;;  %s1106_s4 = inlined_call_operand.vmem [shape: f32[32,1], index: 4, kind: input, shape index: {}]   ;;  %s1107_s5 = inlined_call_operand.vmem [shape: f32[32,1], index: 5, kind: input, shape index: {}]   ;;  %s1108_s6 = inlined_call_operand.vmem [shape: f32[4,32], index: 6, kind: input, shape index: {}]   ;;  %s1109_s7 = inlined_call_operand.vmem [shape: f32[4,1], index: 7, kind: input, shape index: {}]   ;;  %s1110_s8 = inlined_call_operand.vmem [shape: f32[2,1,1], index: 8, kind: output, shape index: {}]  }
   0x1   :  { %s974_s29 = smov 0  }
   0x2 LB: > { %s761_s30 = sadd.s32 4294967295, %s918_s29   ;;  %s31_s9 = sadd.s32 1, %s914_s28  ;;  %s918_s29 = sphi %s974_s29, %s19_s29   ;;  %s914_s28 = sphi %s972_s28, %s1114_s28   ;;  %s910_s27 = sphi %s970_s27, %s1113_s27  }
   0x3   : > { %p33_p0 = scmp.ge.s32.totalorder %s31_s9, 2  ;;  %p763_p1 = scmp.ge.s32.totalorder %s918_s29, 1 }
   0x4   : > { %p244_p2 = scmp.lt.s32.totalorder %s918_s29, 3  ;;  %p995_p4 = scmp.eq.s32.totalorder %s761_s30, 0 }
   0x5   : > { %s1116_s9 = smov (%p33_p0, %s31_s9), 0  ;;  %s257_s14 = sshll.u32 %s1102_s0, 4  ;;  %s258_s14 = int_to_ptr.vmem [resolvable:$true] %s257_s14 }
   0x6   : > { %p991_p3 = pnand %p763_p1, %p244_p2  ;;  %s877_s15 = scalar_lea.vmem %s258_s14, 32 }
   0x7   : > { %p878_p7 = scmp.ne.s32.totalorder %s258_s14, %s877_s15  ;;  %p885_p11 = scmp.lt.s32.totalorder %s258_s14, %s258_s14 }
   0x8   : > { %p824_p5 = pneg %p991_p3  ;;  %p886_p12 = scmp.lt.s32.totalorder %s877_s15, %s877_s15 }
   0xa   : > { %p825_p6 = pnand %p995_p4, %p824_p5  ;;  %p887_p13 = por %p886_p12, %p885_p11 }
   0xc   : > { %p879_p8 = pneg %p825_p6 }
   0xe   : > { %p880_p9 = pnand %p879_p8, %p878_p7 }
  0x10   : > { %p881_p10 = pneg %p880_p9 }
  0x12   : > { %p888_p0 = pnand %p887_p13, %p881_p10 }
  0x14   : > { %891 = shalt.err (!%p888_p0)
}
  0x15   : > { %s920_s16 = smov [#allocation3]   ;;  %305 = sbr.rel (%p991_p3) target bundleno = 741 (0x2e5), region = 52 }
  0x16   : > { %827 = dma.vmem_to_smem (!%p825_p6), %s258_s14, 32, %s920_s16, [#allocation4]  }
  0x1c   : > { %905 = dma.done.wait (%p995_p4), [#allocation4], 32  }
  0x1d   : > { %907 = vsyncadd (%p995_p4), [#allocation4], 4294967264 }
  0x1e   : > { %311 = sfence }
  0x1f   : > { %p347_p1 = scmp.lt.s32.totalorder %s910_s27, 1  ;;  %s1014_s17 = sshll.u32 %s910_s27, 7  ;;  %v405_v0 = vld [vmem:[%s1105_s3] sm:$0xff]  ;;  %vm429_vm0 = vcmask 31744   ;;  %v921_v1 = vmov 0   ;;  %vm442_vm1 = vcmask 1043456  }
  0x20   : > { %s370_s20 = sld [smem:[#allocation3 + %s1014_s17]]  ;;  %s371_s21 = sadd.s32 1, %s1014_s17  ;;  %795 = vmatprep.mubr.msk.f32.mxu0 %vm429_vm0, %v405_v0  ;;  %859 = vset.pattern.permute.xlu0 %v921_v1  ;;  %v388_v8 = vld [vmem:[%s1107_s5] sm:$0xff]  ;;  %v389_v9 = vld [vmem:[%s1107_s5 + $0x8] sm:$0xff]  ;;  %v390_v10 = vld [vmem:[%s1107_s5 + $0x10] sm:$0xff]  ;;  %v922_v30 = vmov 0.0|0.0  }
  0x21   : > { %s1118_s27 = smov (!%p347_p1, %s910_s27), 1  ;;  %860 = vset.pattern.permute.xlu1 %v921_v1  ;;  %s372_s22 = sld [smem:[#allocation3 + %s371_s21]]  ;;  %v391_v11 = vld [vmem:[%s1107_s5 + $0x18] sm:$0xff]  ;;  %v406_v13 = vld [vmem:[%s1105_s3 + $0x8] sm:$0xff]  ;;  %v397_v15 = vld [vmem:[%s1106_s4] sm:$0xff]  ;;  %812 = vmatprep.subr.bf16.mxu1 %v922_v30  ;;  %v923_v31 = vmov 0.0  }
  0x22   : > { %s768_s23 = sshll.u32 %s1118_s27, 2  ;;  %s377_s12 = sadd.s32 4, %s1014_s17  ;;  %v399_v16 = vld [vmem:[%s1106_s4 + $0x10] sm:$0xff]  ;;  %v398_v22 = vld [vmem:[%s1106_s4 + $0x8] sm:$0xff]  ;;  %v400_v23 = vld [vmem:[%s1106_s4 + $0x18] sm:$0xff]  ;;  %vm924_vm2 = vmmov 0  }
  0x23   : > { %s353_s26 = scalar_lea.vmem %s1103_s1, %s768_s23  ;;  %s360_s11 = scalar_lea.vmem %s1104_s2, %s768_s23  ;;  %v407_v17 = vld [vmem:[%s1105_s3 + $0x10] sm:$0xff]  ;;  %v408_v26 = vld [vmem:[%s1105_s3 + $0x18] sm:$0xff]  ;;  %v560_v29 = vld [vmem:[%s1109_s7] sm:$0xf]  ;;  %368 = vst [vmem:[#allocation2] sm:$0xf] %v923_v31  ;;  %809 = vmatprep.mubr.msk.f32.mxu1 %vm924_vm2, %v923_v31 }
  0x24   : > { %v382_v2 = vld [vmem:[%s360_s11] sm:$0xf]  ;;  %s378_s13 = sld [smem:[#allocation3 + %s377_s12]]  ;;  %vm566_vm3 = vcmask 261120   ;;  %s373_s24 = sadd.s32 2, %s1014_s17  ;;  %vm673_vm5 = vcmask 0  }
  0x25   : > { %v1033_v3 = vld [vmem:[%s353_s26] sm:$0xf]  ;;  %s375_s25 = sadd.s32 3, %s1014_s17  ;;  %s374_s26 = sld [smem:[#allocation3 + %s373_s24]] }
  0x26   : > { %v383_v4 = vstv %s370_s20  ;;  %s376_s30 = sld [smem:[#allocation3 + %s375_s25]]  ;;  %s379_s10 = sadd.s32 5, %s1014_s17 }
  0x27   : > { %v384_v5 = vmul.f32 %v383_v4, %v382_v2  ;;  %v386_v6 = vstv %s372_s22  ;;  %v559_v2 = vld [vmem:[%s1108_s6] sm:$0xf]  ;;  %s380_s11 = sld [smem:[#allocation3 + %s379_s10]]  ;;  %s363_s15 = scalar_lea.vmem %s1110_s8, %s1118_s27 }
  0x29   : > { %v1036_v7 = vadd.f32 %v384_v5, %v1033_v3 }
  0x2a   : > { %v392_v14 = vstv %s378_s13 }
  0x2b   : > { %v387_v12 = vmul.f32 %v386_v6, %v1036_v7  ;;  %v393_v18 = vmul.f32 %v392_v14, %v388_v8  ;;  %v394_v19 = vmul.f32 %v392_v14, %v389_v9  ;;  %v395_v20 = vmul.f32 %v392_v14, %v390_v10 }
  0x2c   : > { %v396_v21 = vmul.f32 %v392_v14, %v391_v11  ;;  %v640_v4 = vstv %s374_s26  ;;  %v642_v8 = vstv %s376_s30  ;;  %v648_v9 = vlaneseq }
  0x2d   : > { %793 = vmatprep.subr.msk.mxu0 %vm442_vm1, %v387_v12  ;;  %v401_v24 = vadd.f32 %v397_v15, %v393_v18  ;;  %v403_v25 = vadd.f32 %v399_v16, %v395_v20  ;;  %v402_v27 = vadd.f32 %v398_v22, %v394_v19  ;;  %v641_v10 = vmul.f32 %v640_v4, %v1036_v7  ;;  %v654_v18 = vld [vmem:[#allocation2] sm:$0xf] }
  0x2e   : > { %794 = vmatpush3.msk.msra.mxu0 %vm442_vm1, %v387_v12  ;;  %v404_v28 = vadd.f32 %v400_v23, %v396_v21  ;;  %v649_v14 = vand.u32 127, %v648_v9 }
  0x2f   : > { %796 = vmatmul.mubr.msk.f32.vlgmr.msra.gmra.mrb[0].mxu0 %vm429_vm0, %v406_v13  ;;  %411 = vperm.xlu0 %859, %v401_v24  }
  0x30   : > { %798 = vmatprep.mubr.msk.f32.mxu0 %vm429_vm0, %v407_v17  ;;  %421 = vperm.xlu1 %860, %v403_v25   ;;  %vm652_vm4 = vcmp.lt.s32.totalorder %v649_v14, 16 }
  0x33   : > { %799 = vmatmul.mubr.msk.f32.gmra.mrb[2].mxu0 %vm429_vm0, %v408_v26  ;;  %416 = vperm.xlu0 %859, %v402_v27  }
  0x34   : > { %426 = vperm.xlu1 %860, %v404_v28  }
  0x37   : > { %563 = vperm.xlu0 %859, %v560_v29  }
  0xae   : > { %v412_v32 = vpop.permute.xlu0 %411 }
  0xaf   : > { %v422_v33 = vpop.permute.xlu1 %421 }
  0xb2   : > { %v417_v34 = vpop.permute.xlu0 %416 }
  0xb3   : > { %v427_v40 = vpop.permute.xlu1 %426 }
  0xb6   : > { %v564_v5 = vpop.permute.xlu0 %563 }
 0x102   : > { %v797_v35 = vpop.f32.mrb[0].mxu0 }
 0x103   : > { %v518_v36 = vadd.f32 %v797_v35, %v417_v34  ;;  %v512_v37 = vpop.f32.mrb[1].mxu0 }
 0x104   : > { %v513_v38 = vadd.f32 %v512_v37, %v412_v32 }
 0x105   : > { %v777_v39 = vmul.f32 -1.442695, %v518_v36 }
 0x106   : > { %v776_v41 = vmul.f32 -1.442695, %v513_v38  ;;  %v800_v42 = vpop.f32.mrb[2].mxu0 }
 0x107   : > { %861 = vpow2.f32 %v777_v39  ;;  %v528_v43 = vadd.f32 %v800_v42, %v427_v40  ;;  %v522_v44 = vpop.f32.mrb[3].mxu0 }
 0x108   : > { %863 = vpow2.f32 %v776_v41  ;;  %v523_v45 = vadd.f32 %v522_v44, %v422_v33 }
 0x109   : > { %v779_v46 = vmul.f32 -1.442695, %v528_v43 }
 0x10a   : > { %v778_v47 = vmul.f32 -1.442695, %v523_v45 }
 0x10b   : > { %865 = vpow2.f32 %v779_v46 }
 0x10c   : > { %867 = vpow2.f32 %v778_v47 }
 0x111   : > { %v862_v48 = vpop.eup %861 }
 0x112   : > { %v864_v49 = vpop.eup %863  ;;  %v544_v50 = vadd.f32 1.0, %v862_v48 }
 0x113   : > { %v543_v51 = vadd.f32 1.0, %v864_v49 }
 0x114   : > { %869 = vrcp.f32 %v544_v50 }
 0x115   : > { %v866_v52 = vpop.eup %865  ;;  %871 = vrcp.f32 %v543_v51 }
 0x116   : > { %v868_v53 = vpop.eup %867  ;;  %v546_v54 = vadd.f32 1.0, %v866_v52 }
 0x117   : > { %v545_v55 = vadd.f32 1.0, %v868_v53 }
 0x118   : > { %873 = vrcp.f32 %v546_v54 }
 0x119   : > { %875 = vrcp.f32 %v545_v55 }
 0x11e   : > { %v870_v56 = vpop.eup %869 }
 0x11f   : > { %v872_v57 = vpop.eup %871  ;;  %v556_v58 = vmul.f32 %v870_v56, %v518_v36 }
 0x120   : > { %v555_v59 = vmul.f32 %v872_v57, %v513_v38 }
 0x122   : > { %v874_v60 = vpop.eup %873  ;;  %v813_v61 = vpack.c.bf16 %v556_v58, %v555_v59 }
 0x123   : > { %v876_v62 = vpop.eup %875  ;;  %v558_v63 = vmul.f32 %v874_v60, %v528_v43 }
 0x124   : > { %v557_v0 = vmul.f32 %v876_v62, %v523_v45  ;;  %814 = vmatpush3.bf16.msra.mxu1 %v813_v61 }
 0x125   : > { %815 = vmatprep.subr.bf16.mxu1 %v922_v30 }
 0x126   : > { %v816_v1 = vpack.c.bf16 %v558_v63, %v557_v0 }
 0x128   : > { %817 = vmatpush3.bf16.msra.mxu1 %v816_v1 }
 0x12b   : > { %810 = vmatmul.mubr.msk.f32.vlgmr.msra.gmra.mrb[0].mxu1 %vm566_vm3, %v559_v2 }
 0x1fe   : > { %v636_v6 = vpop.f32.mrb[0].mxu1 }
 0x1ff   : > { %v637_v11 = vadd.f32 %v636_v6, %v564_v5  ;;  %v811_v12 = vpop.f32.mrb[1].mxu1 }
 0x201   : > { %v643_v13 = vmul.f32 %v642_v8, %v637_v11 }
 0x203   : > { %v644_v15 = vadd.f32 %v643_v13, %v641_v10 }
 0x205   : > { %v645_v16 = vsub.f32 %v644_v15, %v1033_v3 }
 0x207   : > { %v646_v17 = vmul.f32 %v645_v16, %v645_v16 }
 0x209   : > { %v653_v19 = vsel %vm652_vm4, %v646_v17, 0.0 }
 0x20a   : > { %v655_v20 = vadd.f32 %v654_v18, %v653_v19 }
 0x20c   : > { %656 = vst [vmem:[#allocation2] sm:$0xf] %v655_v20 }
 0x213   : > { %v660_v21 = vld [vmem:[#allocation2] sm:$0xf] }
 0x214   : > { %v661_v22 = vsel %vm442_vm1, %v660_v21, 0.0 }
 0x215   : > { %662 = vadd.xlane.f32.xlu1 %v661_v22 }
 0x2a2   : > { %v663_v7 = vpop.xlane.xlu1 %662 }
 0x2a3   : > { %v664_v23 = vrot.slane %v663_v7, 4 }
 0x2a5   : > { %v665_v24 = vadd.f32 %v664_v23, %v663_v7 }
 0x2a7   : > { %v666_v25 = vrot.slane %v665_v24, 2 }
 0x2a9   : > { %v667_v26 = vadd.f32 %v666_v25, %v665_v24 }
 0x2ab   : > { %v668_v27 = vrot.slane %v667_v26, 1 }
 0x2ad   : > { %v669_v28 = vadd.f32 %v668_v27, %v667_v26 }
 0x2af   : > { %818 = vpush %v669_v28 }
 0x2e0   : > { %s819_s12 = spop %818 }
 0x2e1   : > { %s671_s16 = smul.f32 %s819_s12, %s380_s11 }
 0x2e3   : > { %v672_v3 = vstv %s671_s16 }
 0x2e4   : > { %674 = vst.msk [vmem:[%s363_s15] sm:$0x1] %vm673_vm5, %v672_v3 }
 0x2e5 PF: > { %s19_s29 = sadd.s32 1, %s918_s29   ;;  %s1113_s27 = smov %s914_s28 }
 0x2e6   : > { %p16_p2 = scmp.ge.s32.totalorder %s19_s29, 4   ;;  %s1114_s28 = smov %s1116_s9 }
 0x2e8   :  { %18 = sbr.rel (!%p16_p2) target bundleno = 2 (0x2), region = 98 }
 0x2ef   :  { %692 = vsyncpa [#allocation4], 1 }
 0x2f0   :  { %694 = vsyncpa [#allocation4 + $0x1], 1 }

</bundles_post_ra>
